<compile_context>
chip_gen: v6e
topology: v6e:2x2x1
jax: 0.10.0
libtpu: 0.0.40
codegen_flags: <defaults>
</compile_context>

<pallas_src>
import functools

import jax
import jax.numpy as jnp
from jax.experimental import pallas as pl
from jax.experimental.pallas import tpu as pltpu

LANE = 128


def basic_mlp_kernel(x_ref, w_ref, out_ref, *, num_layers, d_in):
    # x_ref  : (tb, d_in)     unpadded f32 input tile
    # w_ref  : (L, 128, 128)  bf16 packed weights; row 127 of layer k holds
    #                         bias_k (and a 1.0 at [127,127] for k < L-1 to keep
    #                         the bias lane alive). Last layer's columns are
    #                         shifted to [d_h : d_h+d_out).
    # out_ref: (tb, 128)      bf16; lanes [0:d_h] = h, lanes [d_h:d_h+d_out] = logits
    L = num_layers

    x = x_ref[...].astype(jnp.bfloat16)                      # (tb, d_in)
    w0 = w_ref[0, 0:d_in, :]                                 # (d_in, 128) bf16
    b0 = w_ref[0, LANE - 1:LANE, :].astype(jnp.float32)      # (1, 128) bias row (+1.0 at lane 127)
    a = jnp.dot(x, w0, preferred_element_type=jnp.float32) + b0

    for k in range(1, L - 1):
        a = jnp.dot(jnp.maximum(a, 0.0).astype(jnp.bfloat16), w_ref[k],
                    preferred_element_type=jnp.float32)

    h = a                                                    # pre-ReLU enc(x); lane 127 == 1
    logits = jnp.dot(jnp.maximum(h, 0.0).astype(jnp.bfloat16), w_ref[L - 1],
                     preferred_element_type=jnp.float32)     # nonzero only in lanes [d_h:d_h+d_out)

    lane = jax.lax.broadcasted_iota(jnp.int32, h.shape, 1)
    h_masked = jnp.where(lane == (LANE - 1), 0.0, h)         # drop the bias lane
    out_ref[...] = (h_masked + logits).astype(out_ref.dtype) # single unmasked 128-lane store


def pack_params(weights, biases):
    """Fold all Linear weights + biases into one (L, 128, 128) bf16 slab.

    Last layer's output columns are shifted by d_h so logits and h share one
    128-lane output slab.
    """
    L = len(weights)
    d_h = weights[-1].shape[0]
    slab = jnp.zeros((L, LANE, LANE), jnp.float32)
    for k, (w, b) in enumerate(zip(weights, biases)):
        din, dout = w.shape
        col0 = d_h if k == L - 1 else 0
        slab = slab.at[k, :din, col0:col0 + dout].set(w)
        slab = slab.at[k, LANE - 1, col0:col0 + dout].set(b)     # bias row
        if k < L - 1:
            slab = slab.at[k, LANE - 1, LANE - 1].set(1.0)       # propagate bias lane
    return slab.astype(jnp.bfloat16)


def basic_mlp_forward(x, weights, biases):
    """Pallas forward for BasicMLP: returns (cls(h), None, h)."""
    L = len(weights)
    B, d_in = x.shape
    d_h = weights[-1].shape[0]    # arch[-2]
    d_out = weights[-1].shape[1]  # arch[-1]
    assert d_in <= LANE, "input dim must fit in 128 lanes"
    assert all(w.shape[1] <= LANE - 1 for w in weights[:-1]), \
        "intermediate dims must be <= 127 (lane 127 is the bias lane)"
    assert d_h + d_out <= LANE, "packed output (h|logits) must fit in 128 lanes"

    slab = pack_params(weights, biases)

    def round_up(a, m):
        return -(-a // m) * m

    # Batch tiling: one step for small B (latency floor), >= 2 steps with tiles
    # up to 512 rows for large B (feeds both v7x TensorCores, ~85% HBM roofline).
    if B <= 256:
        tb = max(8, round_up(B, 8))                 # tb == bp, single grid step
    else:
        tb = min(512, round_up(pl.cdiv(B, 2), 16))  # multiple of 16 for bf16 output tiling
    bp = round_up(B, tb)

    x = x.astype(jnp.float32)
    xp = x if bp == B else jnp.zeros((bp, d_in), jnp.float32).at[:B].set(x)

    grid = (bp // tb,)
    flops = 2 * bp * (d_in * LANE + (L - 1) * LANE * LANE)
    bytes_accessed = 4 * bp * d_in + 2 * L * LANE * LANE + 2 * bp * LANE

    out = pl.pallas_call(
        functools.partial(basic_mlp_kernel, num_layers=L, d_in=d_in),
        out_shape=jax.ShapeDtypeStruct((bp, LANE), jnp.bfloat16),
        grid=grid,
        in_specs=[
            pl.BlockSpec((tb, d_in), lambda i: (i, 0)),          # unpadded x tile per step
            pl.BlockSpec((L, LANE, LANE), lambda i: (0, 0, 0)),  # weights stay VMEM-resident
        ],
        out_specs=pl.BlockSpec((tb, LANE), lambda i: (i, 0)),
        compiler_params=pltpu.CompilerParams(
            dimension_semantics=("parallel",)),
        cost_estimate=pl.CostEstimate(
            flops=flops, transcendentals=0, bytes_accessed=bytes_accessed),
    )(xp, slab)

    h = out[:B, :d_h].astype(jnp.float32)
    logits = out[:B, d_h:d_h + d_out].astype(jnp.float32)
    return logits, None, h


def init_linear(key, fan_in, fan_out):
    """Deterministic PyTorch-style Linear init; weight stored as (in, out)."""
    kw, kb = jax.random.split(key)
    bound = 1.0 / jnp.sqrt(float(fan_in))
    w = jax.random.uniform(kw, (fan_in, fan_out), jnp.float32, -bound, bound)
    b = jax.random.uniform(kb, (fan_out,), jnp.float32, -bound, bound)
    return w, b


def reference_forward(x, weights, biases):
    h = x @ weights[0] + biases[0]
    for k in range(1, len(weights) - 1):
        h = jnp.maximum(h, 0.0) @ weights[k] + biases[k]
    logits = jnp.maximum(h, 0.0) @ weights[-1] + biases[-1]
    return logits, None, h


if __name__ == "__main__":
    # BasicMLP(arch=[16, 32, 32, 8], activation='relu', backbone=None)
    arch = [16, 32, 32, 8]
    B = 8

    key = jax.random.PRNGKey(0)
    keys = jax.random.split(key, len(arch))

    weights, biases = [], []
    for k in range(len(arch) - 1):          # enc Linears + cls Linear
        w, b = init_linear(keys[k], arch[k], arch[k + 1])
        weights.append(w)
        biases.append(b)

    x = jax.random.normal(keys[-1], (B, arch[0]), jnp.float32)

    logits, aux, h = basic_mlp_forward(x, weights, biases)
    jax.block_until_ready((logits, h))

    # sanity check against a pure-JAX f32 reference (bf16 weights/activations
    # on the kernel path -> loosened tolerance)
    ref_logits, _, ref_h = reference_forward(x, weights, biases)
    assert aux is None
    assert logits.shape == (B, arch[-1]) and h.shape == (B, arch[-2])
    assert jnp.allclose(logits, ref_logits, atol=2e-2, rtol=2e-2)
    assert jnp.allclose(h, ref_h, atol=2e-2, rtol=2e-2)

    print("KERNEL_OK")
</pallas_src>

<mosaic_0001>
module attributes {stable_mosaic.version = 11 : i64} {
  func.func @basic_mlp_kernel(%arg0: i32, %arg1: memref<8x16xf32, #tpu.memory_space<vmem>>, %arg2: memref<3x128x128xbf16, #tpu.memory_space<vmem>>, %arg3: memref<8x128xbf16, #tpu.memory_space<vmem>>) attributes {dimension_semantics = [#tpu.dimension_semantics<parallel>], iteration_bounds = array<i64: 1>, scalar_prefetch = 0 : i64, scratch_operands = 0 : i64, tpu.core_type = #tpu.core_type<tc>, window_params = [{transform_indices = @transform_0, window_bounds = array<i64: 8, 16>}, {pipeline_mode = #tpu.pipeline_mode<synchronous>, transform_indices = @transform_1, window_bounds = array<i64: 3, 128, 128>}, {transform_indices = @transform_2, window_bounds = array<i64: 8, 128>}]} {
    %c0 = arith.constant 0 : index
    %c0_0 = arith.constant 0 : index
    %0 = vector.load %arg1[%c0, %c0_0] : memref<8x16xf32, #tpu.memory_space<vmem>>, vector<8x16xf32>
    %1 = arith.truncf %0 : vector<8x16xf32> to vector<8x16xbf16>
    %c0_1 = arith.constant 0 : index
    %c0_2 = arith.constant 0 : index
    %c0_3 = arith.constant 0 : index
    %2 = vector.load %arg2[%c0_1, %c0_2, %c0_3] : memref<3x128x128xbf16, #tpu.memory_space<vmem>>, vector<1x16x128xbf16>
    %3 = vector.shape_cast %2 : vector<1x16x128xbf16> to vector<16x128xbf16>
    %c0_4 = arith.constant 0 : index
    %c127 = arith.constant 127 : index
    %c0_5 = arith.constant 0 : index
    %4 = vector.load %arg2[%c0_4, %c127, %c0_5] : memref<3x128x128xbf16, #tpu.memory_space<vmem>>, vector<1x1x128xbf16>
    %5 = vector.shape_cast %4 : vector<1x1x128xbf16> to vector<1x128xbf16>
    %6 = arith.extf %5 : vector<1x128xbf16> to vector<1x128xf32>
    %cst = arith.constant dense<0.000000e+00> : vector<8x128xf32>
    %7 = tpu.matmul %1, %3, %cst {dimension_numbers = #tpu.dot_dimension_numbers<[1], [0], [0], [1], [0, 0, 1, 1], [], []>} : vector<8x16xbf16>, vector<16x128xbf16>, vector<8x128xf32> -> vector<8x128xf32>
    %8 = vector.broadcast %6 : vector<1x128xf32> to vector<8x128xf32>
    %9 = arith.addf %7, %8 : vector<8x128xf32>
    %cst_6 = arith.constant 0.000000e+00 : f32
    %10 = vector.broadcast %cst_6 : f32 to vector<8x128xf32>
    %11 = arith.maximumf %9, %10 : vector<8x128xf32>
    %12 = arith.truncf %11 : vector<8x128xf32> to vector<8x128xbf16>
    %c1 = arith.constant 1 : index
    %c0_7 = arith.constant 0 : index
    %c0_8 = arith.constant 0 : index
    %13 = vector.load %arg2[%c1, %c0_7, %c0_8] : memref<3x128x128xbf16, #tpu.memory_space<vmem>>, vector<1x128x128xbf16>
    %14 = vector.shape_cast %13 : vector<1x128x128xbf16> to vector<128x128xbf16>
    %cst_9 = arith.constant dense<0.000000e+00> : vector<8x128xf32>
    %15 = tpu.matmul %12, %14, %cst_9 {dimension_numbers = #tpu.dot_dimension_numbers<[1], [0], [0], [1], [0, 0, 1, 1], [], []>} : vector<8x128xbf16>, vector<128x128xbf16>, vector<8x128xf32> -> vector<8x128xf32>
    %cst_10 = arith.constant 0.000000e+00 : f32
    %16 = vector.broadcast %cst_10 : f32 to vector<8x128xf32>
    %17 = arith.maximumf %15, %16 : vector<8x128xf32>
    %18 = arith.truncf %17 : vector<8x128xf32> to vector<8x128xbf16>
    %c2 = arith.constant 2 : index
    %c0_11 = arith.constant 0 : index
    %c0_12 = arith.constant 0 : index
    %19 = vector.load %arg2[%c2, %c0_11, %c0_12] : memref<3x128x128xbf16, #tpu.memory_space<vmem>>, vector<1x128x128xbf16>
    %20 = vector.shape_cast %19 : vector<1x128x128xbf16> to vector<128x128xbf16>
    %cst_13 = arith.constant dense<0.000000e+00> : vector<8x128xf32>
    %21 = tpu.matmul %18, %20, %cst_13 {dimension_numbers = #tpu.dot_dimension_numbers<[1], [0], [0], [1], [0, 0, 1, 1], [], []>} : vector<8x128xbf16>, vector<128x128xbf16>, vector<8x128xf32> -> vector<8x128xf32>
    %22 = tpu.iota {dimensions = array<i32: 1>} : vector<8x128xi32>
    %c127_i32 = arith.constant 127 : i32
    %23 = vector.broadcast %c127_i32 : i32 to vector<8x128xi32>
    %24 = arith.cmpi eq, %22, %23 : vector<8x128xi32>
    %cst_14 = arith.constant 0.000000e+00 : f32
    %25 = vector.broadcast %cst_14 : f32 to vector<8x128xf32>
    %26 = arith.select %24, %25, %15 : vector<8x128xi1>, vector<8x128xf32>
    %27 = arith.addf %26, %21 : vector<8x128xf32>
    %28 = arith.truncf %27 : vector<8x128xf32> to vector<8x128xbf16>
    %c0_15 = arith.constant 0 : index
    %c0_16 = arith.constant 0 : index
    %29 = vector.load %arg3[%c0_15, %c0_16] : memref<8x128xbf16, #tpu.memory_space<vmem>>, vector<8x128xbf16>
    tpu.vector_store %arg3[%c0_15, %c0_16], %28 {strides = array<i32>} : memref<8x128xbf16, #tpu.memory_space<vmem>>, vector<8x128xbf16>,
    return
  }
  func.func @transform_0(%arg0: i32) -> (i32, i32) {
    %c0_i32 = arith.constant 0 : i32
    %c0_i32_0 = arith.constant 0 : i32
    return %arg0, %c0_i32 : i32, i32
  }
  func.func @transform_1(%arg0: i32) -> (i32, i32, i32) {
    %c0_i32 = arith.constant 0 : i32
    %c0_i32_0 = arith.constant 0 : i32
    %c0_i32_1 = arith.constant 0 : i32
    %c0_i32_2 = arith.constant 0 : i32
    return %c0_i32, %c0_i32_0, %c0_i32_1 : i32, i32, i32
  }
  func.func @transform_2(%arg0: i32) -> (i32, i32) {
    %c0_i32 = arith.constant 0 : i32
    %c0_i32_0 = arith.constant 0 : i32
    return %arg0, %c0_i32 : i32, i32
  }
}

</mosaic_0001>

<bundles_post_ra>
// kernel: tpu_custom_call.1
= control target key start
LH: loop header
LB: loop body
LE: loop exit
PB: predicated region body
PF: predicated region fallthrough
CT: control target
= control target key end

     0   :  { %7 = vsyncpa [#allocation3], 0  ;;  %s541_s0 = inlined_call_operand.hbm [shape: f32[8,16], index: 0, kind: input, shape index: {}]   ;;  %s542_s1 = inlined_call_operand.hbm [shape: bf16[3,128,128], index: 1, kind: input, shape index: {}]   ;;  %s543_s2 = inlined_call_operand.hbm [shape: bf16[8,128], index: 2, kind: output, shape index: {}]  }
   0x1   :  { %8 = vsyncpa [#allocation6], 0 }
   0x2   :  { %9 = vsyncpa [#allocation4], 0  ;;  %s510_s9 = smov [#allocation2]   ;;  %s511_s11 = smov [#allocation5]  }
   0x3   :  { %s16_s10 = sshll.u32 %s510_s9, 4  ;;  %s25_s12 = sshll.u32 %s511_s11, 4  ;;  %s17_s10 = int_to_ptr.vmem [resolvable:$true] %s16_s10  ;;  %s26_s12 = int_to_ptr.vmem [resolvable:$true] %s25_s12 }
   0x4   :  { %s452_s13 = scalar_lea.vmem %s17_s10, 128  ;;  %p457_p1 = scmp.lt.s32.totalorder %s17_s10, %s17_s10 }
   0x5   :  { %p453_p0 = scmp.ne.s32.totalorder %s17_s10, %s452_s13  ;;  %p458_p2 = scmp.lt.s32.totalorder %s452_s13, %s452_s13 }
   0x7   :  { %p459_p3 = por %p458_p2, %p457_p1 }
   0x9   :  { %p460_p4 = pnand %p459_p3, %p453_p0 }
   0xb   :  { %463 = shalt.err (!%p460_p4)
}
   0xc   :  { %19 = dma.hbm_to_vmem [thread:$0]  %s541_s0, 128, %s17_s10, [#allocation3]  }
   0xd   :  { %s472_s16 = scalar_lea.vmem %s26_s12, 3072  ;;  %p477_p6 = scmp.lt.s32.totalorder %s26_s12, %s26_s12 }
   0xe   :  { %p473_p5 = scmp.ne.s32.totalorder %s26_s12, %s472_s16  ;;  %p478_p7 = scmp.lt.s32.totalorder %s472_s16, %s472_s16 }
  0x10   :  { %p479_p8 = por %p478_p7, %p477_p6 }
  0x12   :  { %p480_p9 = pnand %p479_p8, %p473_p5 }
  0x14   :  { %483 = shalt.err (!%p480_p9)
}
  0x15   :  { %s512_s17 = smov 64   ;;  %s513_s18 = smov 4  }
  0x16   :  { %31 = dma.hbm_to_vmem [thread:$0]  %s542_s1, 3072, %s26_s12, [#allocation6], %s512_s17, %s512_s17, %s513_s18  }
  0x17   :  { %504 = dma.done.wait [#allocation3], 128  }
  0x18   :  { %505 = vsyncadd [#allocation3], 4294967168 }
  0x19   :  { %506 = dma.done.wait [#allocation6], 3072  }
  0x1a   :  { %507 = vsyncadd [#allocation6], 4294964224  ;;  %v514_v0 = vmov 0.0   ;;  %vm515_vm0 = vmmov 0   ;;  %v427_v1 = vld [vmem:[#allocation5] sm:$0xff]   ;;  %v39_v2 = vld [vmem:[#allocation2] sm:$0xff]  ;;  %v45_v19 = vlaneseq }
  0x1b   :  { %374 = vmatprep.subr.bf16.mxu0 %v514_v0  ;;  %376 = vmatprep.mubr.msk.bf16.mxu0 %vm515_vm0, %v514_v0  ;;  %v40_v3 = vpack.c.bf16 %v39_v2, %v39_v2  ;;  %vm55_vm1 = vcmask 130048   ;;  %v428_v4 = vld [vmem:[#allocation5 + $0x78] sm:$0xff]   ;;  %v429_v5 = vld [vmem:[#allocation5 + $0x70] sm:$0xff]   ;;  %v430_v6 = vld [vmem:[#allocation5 + $0x68] sm:$0xff]   ;;  %s516_s0 = smov [#allocation7]  }
  0x1c   :  { %380 = vmatprep.subr.bf16.mxu1 %v514_v0  ;;  %396 = vmatprep.mubr.msk.bf16.mxu1 %vm515_vm0, %v514_v0  ;;  %v431_v7 = vld [vmem:[#allocation5 + $0x60] sm:$0xff]   ;;  %v432_v8 = vld [vmem:[#allocation5 + $0x58] sm:$0xff]   ;;  %v433_v9 = vld [vmem:[#allocation5 + $0x50] sm:$0xff]   ;;  %v46_v20 = vshrl.u32 %v45_v19, 7  ;;  %v314_v39 = vand.u32 127, %v45_v19  ;;  %s326_s1 = sshll.u32 %s516_s0, 4  ;;  %s327_s1 = int_to_ptr.vmem [resolvable:$true] %s326_s1 }
  0x1d   :  { %375 = vmatpush3.bf16.msra.mxu0 %v427_v1  ;;  %381 = vmatpush3.bf16.msra.mxu1 %v428_v4  ;;  %v434_v10 = vld [vmem:[#allocation5 + $0x48] sm:$0xff]   ;;  %v435_v11 = vld [vmem:[#allocation5 + $0x40] sm:$0xff]   ;;  %v436_v12 = vld [vmem:[#allocation5 + $0xb8] sm:$0xff]   ;;  %s484_s21 = scalar_lea.vmem %s327_s1, 64  ;;  %p489_p11 = scmp.lt.s32.totalorder %s327_s1, %s327_s1 }
  0x1e   :  { %400 = vmatprep.subr.bf16.mxu0 %v514_v0  ;;  %382 = vmatprep.subr.bf16.mxu1 %v514_v0  ;;  %v437_v13 = vld [vmem:[#allocation5 + $0xb0] sm:$0xff]   ;;  %v438_v14 = vld [vmem:[#allocation5 + $0xa8] sm:$0xff]   ;;  %v439_v15 = vld [vmem:[#allocation5 + $0xa0] sm:$0xff]   ;;  %v47_v23 = vsub.s32 7, %v46_v20  ;;  %vm315_vm2 = vcmp.eq.s32.totalorder %v314_v39, 127  ;;  %p485_p10 = scmp.ne.s32.totalorder %s327_s1, %s484_s21  ;;  %p490_p12 = scmp.lt.s32.totalorder %s484_s21, %s484_s21 }
  0x1f   :  { %v440_v16 = vld [vmem:[#allocation5 + $0x98] sm:$0xff]   ;;  %v441_v17 = vld [vmem:[#allocation5 + $0x90] sm:$0xff]   ;;  %v442_v18 = vld [vmem:[#allocation5 + $0x88] sm:$0xff]  }
  0x20   :  { %377 = vmatmul.mubr.msk.bf16.vlgmr.msra.gmra.mxu0 %vm55_vm1, %v40_v3  ;;  %v43_v21 = vld [vmem:[#allocation5 + $0x3c] sm:$0x8]  ;;  %v443_v32 = vld [vmem:[#allocation5 + $0x80] sm:$0xff]   ;;  %p491_p13 = por %p490_p12, %p489_p11 }
  0x21   :  { %416 = vmatprep.mubr.msk.bf16.mxu0 %vm515_vm0, %v514_v0  ;;  %383 = vmatpush3.bf16.msra.mxu1 %v429_v5  ;;  %v44_v22 = vunpack.c.l.bf16 %v43_v21 }
  0x22   :  { %384 = vmatprep.subr.bf16.mxu1 %v514_v0  ;;  %401 = vmatpush3.bf16.msra.mxu0 %v436_v12  ;;  %p492_p0 = pnand %p491_p13, %p485_p10 }
  0x23   :  { %402 = vmatprep.subr.bf16.mxu0 %v514_v0  ;;  %v48_v24 = vrot.slane %v44_v22, %v47_v23 }
  0x25   :  { %385 = vmatpush3.bf16.msra.mxu1 %v430_v6 }
  0x26   :  { %386 = vmatprep.subr.bf16.mxu1 %v514_v0  ;;  %403 = vmatpush3.bf16.msra.mxu0 %v437_v13 }
  0x27   :  { %404 = vmatprep.subr.bf16.mxu0 %v514_v0 }
  0x29   :  { %387 = vmatpush3.bf16.msra.mxu1 %v431_v7 }
  0x2a   :  { %388 = vmatprep.subr.bf16.mxu1 %v514_v0  ;;  %405 = vmatpush3.bf16.msra.mxu0 %v438_v14 }
  0x2b   :  { %406 = vmatprep.subr.bf16.mxu0 %v514_v0 }
  0x2d   :  { %389 = vmatpush3.bf16.msra.mxu1 %v432_v8 }
  0x2e   :  { %390 = vmatprep.subr.bf16.mxu1 %v514_v0  ;;  %407 = vmatpush3.bf16.msra.mxu0 %v439_v15 }
  0x2f   :  { %408 = vmatprep.subr.bf16.mxu0 %v514_v0 }
  0x31   :  { %391 = vmatpush3.bf16.msra.mxu1 %v433_v9 }
  0x32   :  { %392 = vmatprep.subr.bf16.mxu1 %v514_v0  ;;  %409 = vmatpush3.bf16.msra.mxu0 %v440_v16 }
  0x33   :  { %410 = vmatprep.subr.bf16.mxu0 %v514_v0 }
  0x35   :  { %393 = vmatpush3.bf16.msra.mxu1 %v434_v10 }
  0x36   :  { %394 = vmatprep.subr.bf16.mxu1 %v514_v0  ;;  %411 = vmatpush3.bf16.msra.mxu0 %v441_v17 }
  0x37   :  { %412 = vmatprep.subr.bf16.mxu0 %v514_v0 }
  0x39   :  { %395 = vmatpush3.bf16.msra.mxu1 %v435_v11 }
  0x3a   :  { %413 = vmatpush3.bf16.msra.mxu0 %v442_v18 }
  0x3b   :  { %414 = vmatprep.subr.bf16.mxu0 %v514_v0 }
  0x3e   :  { %415 = vmatpush3.bf16.msra.mxu0 %v443_v32 }
  0xe0   :  { %v93_v25 = vpop.f32.mrf.mxu0 }
  0xe1   :  { %v94_v26 = vadd.f32 %v93_v25, %v48_v24 }
  0xe2   :  { %v378_v27 = vpop.f32.mrf.mxu0 }
  0xe3   :  { %v99_v28 = vmax.f32 %v94_v26, 0.0 }
  0xe4   :  { %v96_v29 = vpop.f32.mrf.mxu0 }
  0xe5   :  { %v100_v30 = vpack.c.bf16 %v99_v28, %v99_v28 }
  0xe6   :  { %v379_v31 = vpop.f32.mrf.mxu0 }
  0xe7   :  { %397 = vmatmul.mubr.bf16.vlgmr.msra.gmra.mxu1 %v100_v30 }
 0x1a7   :  { %v200_v33 = vpop.f32.mrf.mxu1 }
 0x1a8   :  { %v206_v34 = vmax.f32 %v200_v33, 0.0  ;;  %v316_v41 = vsel %vm315_vm2, 0.0, %v200_v33 }
 0x1a9   :  { %v398_v35 = vpop.f32.mrf.mxu1 }
 0x1aa   :  { %v207_v36 = vpack.c.bf16 %v206_v34, %v206_v34 }
 0x1ab   :  { %v203_v37 = vpop.f32.mrf.mxu1 }
 0x1ac   :  { %417 = vmatmul.mubr.bf16.vlgmr.msra.gmra.mxu0 %v207_v36 }
 0x1ad   :  { %v399_v38 = vpop.f32.mrf.mxu1 }
 0x26c   :  { %v307_v40 = vpop.f32.mrf.mxu0 }
 0x26d   :  { %v317_v42 = vadd.f32 %v316_v41, %v307_v40 }
 0x26e   :  { %v418_v43 = vpop.f32.mrf.mxu0 }
 0x26f   :  { %v318_v44 = vpack.c.bf16 %v317_v42, %v317_v42 }
 0x270   :  { %v310_v45 = vpop.f32.mrf.mxu0 }
 0x271   :  { %319 = vst [vmem:[#allocation7] sm:$0xf] %v318_v44 }
 0x272   :  { %v419_v46 = vpop.f32.mrf.mxu0 }
 0x273   :  { %495 = shalt.err (!%p492_p0)
}
 0x274   :  { %329 = dma.vmem_to_hbm [thread:$0]  %s327_s1, 64, %s543_s2, [#allocation4]  }
 0x275   :  { %508 = dma.done.wait [#allocation4], 64  }
 0x276   :  { %509 = vsyncadd [#allocation4], 4294967232 }
 0x277   :  { %333 = vsyncpa [#allocation3], 1 }
 0x278   :  { %334 = vsyncpa [#allocation6], 1 }
 0x279   :  { %335 = vsyncpa [#allocation4], 1 }

</bundles_post_ra>
